<compile_context>
chip_gen: v7x
topology: tpu7x:2x2x1
jax: 0.10.0
libtpu: 0.0.40
codegen_flags: <defaults>
</compile_context>

<pallas_src>
import functools

import jax
import jax.numpy as jnp
from jax import lax
from jax.experimental import pallas as pl
from jax.experimental.pallas import tpu as pltpu


def _newbasicblock_kernel(p1_ref, w1t_ref, b1_ref, w2t_ref, bc_ref, o_ref, p2t_ref,
                          *, H, W, Cin, C1):
    """One image per grid step.

    Layout: channels on sublanes, flattened spatial (h*W + w) on lanes, so both
    GEMMs produce lane-dense (C, H*W) results and the output store is unmasked.

      p1_ref : (1, 9*Cin, HW) bf16   im2col^T of the 1-padded input
      w1t_ref: (C1, 9*Cin)    bf16   conv1 weight^T, bn1 scale folded in
      b1_ref : (C1, 1)        f32    bn1 shift
      w2t_ref: (C2, 9*C1+Cin) bf16   [conv2*bn2 ; shortcut*bn_s] weight^T
      bc_ref : (C2, 1)        f32    bn2 shift + shortcut bn shift
      o_ref  : (1, C2, HW)    f32    output block (reshapes straight to NCHW)
      p2t_ref: (9*C1+Cin, HW) bf16   VMEM scratch holding p2^T (conv2 im2col + x)
    """
    HW = H * W
    p1t = p1_ref[0]                                                  # (9*Cin, HW) bf16

    # ---- conv1 (3x3, pad 1) + bn1 scale folded into weights: one GEMM ----
    y1 = jnp.dot(w1t_ref[...], p1t, preferred_element_type=jnp.float32)   # (C1, HW)
    y1 = jnp.maximum(y1 + b1_ref[...], 0.0)                               # f32 epilogue

    # ---- build p2^T with sublane-aligned, full-lane-width stores ----
    # Tap (dh, dw) of the 3x3 conv needs y1 shifted by dh*W + dw lanes with zero
    # fill; the only extra mask needed is "w + dw stays inside the row".
    def shift_lanes(v, s):       # out[:, l] = v[:, l + s], zero-filled at the ends
        if s == 0:
            return v
        z = jnp.zeros((v.shape[0], abs(s)), v.dtype)
        if s > 0:
            return jnp.concatenate([v[:, s:], z], axis=1)
        return jnp.concatenate([z, v[:, :s]], axis=1)

    lane = lax.broadcasted_iota(jnp.int32, (C1, HW), 1)
    if W & (W - 1) == 0:
        wcol = jnp.bitwise_and(lane, W - 1)
    else:
        wcol = lane % W
    base = {
        -1: jnp.where(wcol >= 1, shift_lanes(y1, -1), 0.0),
        0: y1,
        1: jnp.where(wcol <= W - 2, shift_lanes(y1, 1), 0.0),
    }
    t = 0
    for dh in (-1, 0, 1):
        for dw in (-1, 0, 1):
            p2t_ref[t * C1:(t + 1) * C1, :] = (
                shift_lanes(base[dw], dh * W).astype(p2t_ref.dtype))
            t += 1
    # shortcut input: the centre-tap rows of the im2col are the un-padded x^T
    p2t_ref[9 * C1:9 * C1 + Cin, :] = p1t[4 * Cin:5 * Cin, :]

    # ---- conv2 (3x3) + bn2 and the 1x1 shortcut + bn_s fused into ONE GEMM ----
    y2 = jnp.dot(w2t_ref[...], p2t_ref[...], preferred_element_type=jnp.float32)
    o_ref[0] = jnp.maximum(y2 + bc_ref[...], 0.0).astype(o_ref.dtype)


def _fold_params(p, Cin, C1, C2):
    """Fold eval-mode BN scales into the conv weights (exact) and transpose so the
    GEMMs produce (C, HW). Matmul operands bf16, bias/epilogue f32."""
    w1t = (p['w1'].reshape(9 * Cin, C1) * p['s1'][None, :]).T.astype(jnp.bfloat16)
    b1 = p['b1'].reshape(C1, 1).astype(jnp.float32)
    w2s = p['w2'].reshape(9 * C1, C2) * p['s2'][None, :]
    wss = p['ws'] * p['ss'][None, :]
    w2t = jnp.concatenate([w2s, wss], axis=0).T.astype(jnp.bfloat16)   # (C2, 9*C1+Cin)
    bc = (p['b2'] + p['bs']).reshape(C2, 1).astype(jnp.float32)
    return w1t, b1, w2t, bc


def _im2col_t(x_nchw, H, W):
    """Transposed im2col of the 1-padded NCHW input: (N, 9*Cin, H*W),
    rows ordered (kh, kw, cin) to match w.reshape(9*Cin, Cout)."""
    N, Cin = x_nchw.shape[:2]
    xp = jnp.pad(x_nchw, ((0, 0), (0, 0), (1, 1), (1, 1)))
    return jnp.concatenate(
        [xp[:, :, kh:kh + H, kw:kw + W].reshape(N, Cin, H * W)
         for kh in range(3) for kw in range(3)], axis=1)


def new_basicblock_forward(x_nchw, p):
    """x_nchw: (N, Cin, H, W) float32 -> (N, C2, H, W) float32."""
    x = x_nchw.astype(jnp.float32)
    N, Cin, H, W = x.shape
    HW = H * W
    C1 = p['w1'].shape[-1]
    C2 = p['w2'].shape[-1]
    K1 = 9 * Cin
    K2 = 9 * C1 + Cin

    w1t, b1, w2t, bc = _fold_params(p, Cin, C1, C2)
    patches_t = _im2col_t(x, H, W).astype(jnp.bfloat16)        # (N, 9*Cin, HW)

    kernel = functools.partial(_newbasicblock_kernel, H=H, W=W, Cin=Cin, C1=C1)

    out = pl.pallas_call(
        kernel,
        out_shape=jax.ShapeDtypeStruct((N, C2, HW), jnp.float32),
        grid_spec=pltpu.PrefetchScalarGridSpec(
            num_scalar_prefetch=0,
            grid=(N,),
            in_specs=[
                pl.BlockSpec((1, K1, HW), lambda n: (n, 0, 0)),   # im2col^T
                pl.BlockSpec((C1, K1), lambda n: (0, 0)),         # w1^T (bn1 folded)
                pl.BlockSpec((C1, 1), lambda n: (0, 0)),          # bn1 shift
                pl.BlockSpec((C2, K2), lambda n: (0, 0)),         # [w2 ; ws]^T (bn folded)
                pl.BlockSpec((C2, 1), lambda n: (0, 0)),          # bn2 + shortcut-bn shift
            ],
            out_specs=pl.BlockSpec((1, C2, HW), lambda n: (n, 0, 0)),
            scratch_shapes=[pltpu.VMEM((K2, HW), jnp.bfloat16)],
        ),
        compiler_params=pltpu.CompilerParams(dimension_semantics=("parallel",)),
    )(patches_t, w1t, b1, w2t, bc)

    # lane-dense (N, C2, HW) reshapes straight to NCHW -- no transpose needed.
    return out.reshape(N, C2, H, W)


def make_params(key, cin=4, raw1=12, c1=8, raw2=12, c2=8, eps=1e-5):
    """Deterministic synthetic parameters; index_select folded into weights, BN folded."""
    ks = jax.random.split(key, 8)
    # pruning channel-selection indices (out_list in the PyTorch module)
    out_list0 = jnp.array([0, 1, 3, 4, 6, 7, 9, 10], dtype=jnp.int32)   # c1 of raw1
    out_list1 = jnp.array([1, 2, 4, 5, 7, 8, 10, 11], dtype=jnp.int32)  # c2 of raw2

    w1_full = 0.1 * jax.random.normal(ks[0], (3, 3, cin, raw1), jnp.float32)   # HWIO
    w2_full = 0.1 * jax.random.normal(ks[1], (3, 3, c1, raw2), jnp.float32)    # HWIO
    ws = 0.1 * jax.random.normal(ks[2], (cin, c2), jnp.float32)                # 1x1 conv

    def folded_bn(k, c):
        kg, kb, km, kv = jax.random.split(k, 4)
        gamma = 1.0 + 0.1 * jax.random.normal(kg, (c,), jnp.float32)
        beta = 0.1 * jax.random.normal(kb, (c,), jnp.float32)
        mean = 0.1 * jax.random.normal(km, (c,), jnp.float32)
        var = jnp.abs(jax.random.normal(kv, (c,), jnp.float32)) + 0.5
        scale = gamma / jnp.sqrt(var + eps)
        shift = beta - mean * scale
        return scale, shift

    s1, b1 = folded_bn(ks[3], c1)      # bn1 over the selected c1 channels
    s2, b2 = folded_bn(ks[4], c2)      # bn2 over the selected c2 channels
    ss, bs = folded_bn(ks[5], c2)      # bn inside the downsample shortcut

    # torch.index_select(conv_out, 1, idx)  ==  selecting output columns of the weight
    w1 = w1_full[:, :, :, out_list0]
    w2 = w2_full[:, :, :, out_list1]
    return dict(w1=w1, s1=s1, b1=b1, w2=w2, s2=s2, b2=b2, ws=ws, ss=ss, bs=bs)


def matched_reference_forward(x_nchw, p):
    """Pure-JAX reference mirroring the kernel's numerics (bf16 matmul inputs,
    f32 accumulation / epilogue), so a tight tolerance catches layout bugs."""
    x = x_nchw.astype(jnp.float32)
    N, Cin, H, W = x.shape
    HW = H * W
    C1 = p['w1'].shape[-1]
    C2 = p['w2'].shape[-1]
    w1t, b1, w2t, bc = _fold_params(p, Cin, C1, C2)

    p1t = _im2col_t(x, H, W).astype(jnp.bfloat16)                       # (N, 9*Cin, HW)
    y1 = jnp.einsum('ok,nkl->nol', w1t, p1t, preferred_element_type=jnp.float32)
    y1 = jnp.maximum(y1 + b1[None], 0.0)

    y1p = jnp.pad(y1.reshape(N, C1, H, W), ((0, 0), (0, 0), (1, 1), (1, 1)))
    p2t = jnp.concatenate(
        [y1p[:, :, kh:kh + H, kw:kw + W].reshape(N, C1, HW)
         for kh in range(3) for kw in range(3)]
        + [x.reshape(N, Cin, HW)], axis=1).astype(jnp.bfloat16)
    y2 = jnp.einsum('ok,nkl->nol', w2t, p2t, preferred_element_type=jnp.float32)
    out = jnp.maximum(y2 + bc[None], 0.0)
    return out.reshape(N, C2, H, W)


def reference_forward(x_nchw, p):
    """Independent float32 lax.conv reference (loose semantic check)."""
    x = jnp.transpose(x_nchw, (0, 2, 3, 1)).astype(jnp.float32)
    dn = ('NHWC', 'HWIO', 'NHWC')
    conv = functools.partial(lax.conv_general_dilated, window_strides=(1, 1),
                             padding='SAME', dimension_numbers=dn)
    y = conv(x, p['w1']) * p['s1'] + p['b1']
    y = jnp.maximum(y, 0.0)
    y = conv(y, p['w2']) * p['s2'] + p['b2']
    r = conv(x, p['ws'][None, None]) * p['ss'] + p['bs']
    out = jnp.maximum(y + r, 0.0)
    return jnp.transpose(out, (0, 3, 1, 2))


if __name__ == "__main__":
    key = jax.random.PRNGKey(0)
    kx, kp = jax.random.split(key)

    # small shapes consistent with the module: N=2, in_planes=4, planes=8, 16x16 spatial
    x = jax.random.normal(kx, (2, 4, 16, 16), jnp.float32)
    params = make_params(kp)

    out = jax.block_until_ready(new_basicblock_forward(x, params))
    assert out.shape == (2, 8, 16, 16), out.shape

    # Tight check vs the numerics-matched reference (same bf16-input / f32-accumulate
    # regime): catches any layout / shift / fusion bug at 1e-3.
    ref_tight = matched_reference_forward(x, params)
    if not jnp.allclose(out, ref_tight, rtol=1e-3, atol=1e-3):
        raise AssertionError("mismatch vs matched reference, max err %e"
                             % float(jnp.max(jnp.abs(out - ref_tight))))

    # Loose check vs an independent full-f32 lax.conv reference; the slack only
    # covers the deliberate bf16 rounding of the MXU operands.
    ref_conv = reference_forward(x, params)
    if not jnp.allclose(out, ref_conv, rtol=2e-2, atol=2e-2):
        raise AssertionError("mismatch vs conv reference, max err %e"
                             % float(jnp.max(jnp.abs(out - ref_conv))))
    print("KERNEL_OK")
</pallas_src>

<mosaic_0001>
module attributes {stable_mosaic.version = 11 : i64} {
  func.func @_newbasicblock_kernel(%arg0: i32, %arg1: memref<1x36x256xbf16, #tpu.memory_space<vmem>>, %arg2: memref<8x36xbf16, #tpu.memory_space<vmem>>, %arg3: memref<8x1xf32, #tpu.memory_space<vmem>>, %arg4: memref<8x76xbf16, #tpu.memory_space<vmem>>, %arg5: memref<8x1xf32, #tpu.memory_space<vmem>>, %arg6: memref<1x8x256xf32, #tpu.memory_space<vmem>>, %arg7: memref<76x256xbf16, #tpu.memory_space<vmem>>) attributes {dimension_semantics = [#tpu.dimension_semantics<parallel>], iteration_bounds = array<i64: 2>, scalar_prefetch = 0 : i64, scratch_operands = 1 : i64, tpu.core_type = #tpu.core_type<tc>, window_params = [{transform_indices = @transform_0, window_bounds = array<i64: 1, 36, 256>}, {pipeline_mode = #tpu.pipeline_mode<synchronous>, transform_indices = @transform_1, window_bounds = array<i64: 8, 36>}, {pipeline_mode = #tpu.pipeline_mode<synchronous>, transform_indices = @transform_2, window_bounds = array<i64: 8, 1>}, {pipeline_mode = #tpu.pipeline_mode<synchronous>, transform_indices = @transform_3, window_bounds = array<i64: 8, 76>}, {pipeline_mode = #tpu.pipeline_mode<synchronous>, transform_indices = @transform_4, window_bounds = array<i64: 8, 1>}, {transform_indices = @transform_5, window_bounds = array<i64: 1, 8, 256>}]} {
    %c0 = arith.constant 0 : index
    %c0_0 = arith.constant 0 : index
    %c0_1 = arith.constant 0 : index
    %0 = vector.load %arg1[%c0, %c0_0, %c0_1] : memref<1x36x256xbf16, #tpu.memory_space<vmem>>, vector<1x36x256xbf16>
    %1 = vector.shape_cast %0 : vector<1x36x256xbf16> to vector<36x256xbf16>
    %c0_2 = arith.constant 0 : index
    %c0_3 = arith.constant 0 : index
    %2 = vector.load %arg2[%c0_2, %c0_3] : memref<8x36xbf16, #tpu.memory_space<vmem>>, vector<8x36xbf16>
    %cst = arith.constant dense<0.000000e+00> : vector<8x256xf32>
    %3 = tpu.matmul %2, %1, %cst {dimension_numbers = #tpu.dot_dimension_numbers<[1], [0], [0], [1], [0, 0, 1, 1], [], []>} : vector<8x36xbf16>, vector<36x256xbf16>, vector<8x256xf32> -> vector<8x256xf32>
    %c0_4 = arith.constant 0 : index
    %c0_5 = arith.constant 0 : index
    %4 = vector.load %arg3[%c0_4, %c0_5] : memref<8x1xf32, #tpu.memory_space<vmem>>, vector<8x1xf32>
    %5 = vector.broadcast %4 : vector<8x1xf32> to vector<8x256xf32>
    %6 = arith.addf %3, %5 : vector<8x256xf32>
    %cst_6 = arith.constant 0.000000e+00 : f32
    %7 = vector.broadcast %cst_6 : f32 to vector<8x256xf32>
    %8 = arith.maximumf %6, %7 : vector<8x256xf32>
    %9 = tpu.iota {dimensions = array<i32: 1>} : vector<8x256xi32>
    %c15_i32 = arith.constant 15 : i32
    %10 = vector.broadcast %c15_i32 : i32 to vector<8x256xi32>
    %11 = arith.andi %9, %10 : vector<8x256xi32>
    %c1_i32 = arith.constant 1 : i32
    %12 = vector.broadcast %c1_i32 : i32 to vector<8x256xi32>
    %13 = arith.cmpi sge, %11, %12 : vector<8x256xi32>
    %cst_7 = arith.constant 0.000000e+00 : f32
    %14 = vector.broadcast %cst_7 : f32 to vector<8x1xf32>
    %15 = vector.extract_strided_slice %8 {offsets = [0, 0], sizes = [8, 255], strides = [1, 1]} : vector<8x256xf32> to vector<8x255xf32>
    %16 = tpu.concatenate %14, %15 in 1 : vector<8x1xf32>, vector<8x255xf32> -> vector<8x256xf32>
    %cst_8 = arith.constant 0.000000e+00 : f32
    %17 = vector.broadcast %cst_8 : f32 to vector<8x256xf32>
    %18 = arith.select %13, %16, %17 : vector<8x256xi1>, vector<8x256xf32>
    %c14_i32 = arith.constant 14 : i32
    %19 = vector.broadcast %c14_i32 : i32 to vector<8x256xi32>
    %20 = arith.cmpi sle, %11, %19 : vector<8x256xi32>
    %cst_9 = arith.constant 0.000000e+00 : f32
    %21 = vector.broadcast %cst_9 : f32 to vector<8x1xf32>
    %22 = vector.extract_strided_slice %8 {offsets = [0, 1], sizes = [8, 255], strides = [1, 1]} : vector<8x256xf32> to vector<8x255xf32>
    %23 = tpu.concatenate %22, %21 in 1 : vector<8x255xf32>, vector<8x1xf32> -> vector<8x256xf32>
    %cst_10 = arith.constant 0.000000e+00 : f32
    %24 = vector.broadcast %cst_10 : f32 to vector<8x256xf32>
    %25 = arith.select %20, %23, %24 : vector<8x256xi1>, vector<8x256xf32>
    %cst_11 = arith.constant 0.000000e+00 : f32
    %26 = vector.broadcast %cst_11 : f32 to vector<8x16xf32>
    %27 = vector.extract_strided_slice %18 {offsets = [0, 0], sizes = [8, 240], strides = [1, 1]} : vector<8x256xf32> to vector<8x240xf32>
    %28 = tpu.concatenate %26, %27 in 1 : vector<8x16xf32>, vector<8x240xf32> -> vector<8x256xf32>
    %29 = arith.truncf %28 : vector<8x256xf32> to vector<8x256xbf16>
    %c0_12 = arith.constant 0 : index
    %c0_13 = arith.constant 0 : index
    %30 = vector.load %arg7[%c0_12, %c0_13] : memref<76x256xbf16, #tpu.memory_space<vmem>>, vector<8x256xbf16>
    tpu.vector_store %arg7[%c0_12, %c0_13], %29 {strides = array<i32>} : memref<76x256xbf16, #tpu.memory_space<vmem>>, vector<8x256xbf16>,
    %cst_14 = arith.constant 0.000000e+00 : f32
    %31 = vector.broadcast %cst_14 : f32 to vector<8x16xf32>
    %32 = vector.extract_strided_slice %8 {offsets = [0, 0], sizes = [8, 240], strides = [1, 1]} : vector<8x256xf32> to vector<8x240xf32>
    %33 = tpu.concatenate %31, %32 in 1 : vector<8x16xf32>, vector<8x240xf32> -> vector<8x256xf32>
    %34 = arith.truncf %33 : vector<8x256xf32> to vector<8x256xbf16>
    %c8 = arith.constant 8 : index
    %c0_15 = arith.constant 0 : index
    %35 = vector.load %arg7[%c8, %c0_15] : memref<76x256xbf16, #tpu.memory_space<vmem>>, vector<8x256xbf16>
    tpu.vector_store %arg7[%c8, %c0_15], %34 {strides = array<i32>} : memref<76x256xbf16, #tpu.memory_space<vmem>>, vector<8x256xbf16>,
    %cst_16 = arith.constant 0.000000e+00 : f32
    %36 = vector.broadcast %cst_16 : f32 to vector<8x16xf32>
    %37 = vector.extract_strided_slice %25 {offsets = [0, 0], sizes = [8, 240], strides = [1, 1]} : vector<8x256xf32> to vector<8x240xf32>
    %38 = tpu.concatenate %36, %37 in 1 : vector<8x16xf32>, vector<8x240xf32> -> vector<8x256xf32>
    %39 = arith.truncf %38 : vector<8x256xf32> to vector<8x256xbf16>
    %c16 = arith.constant 16 : index
    %c0_17 = arith.constant 0 : index
    %40 = vector.load %arg7[%c16, %c0_17] : memref<76x256xbf16, #tpu.memory_space<vmem>>, vector<8x256xbf16>
    tpu.vector_store %arg7[%c16, %c0_17], %39 {strides = array<i32>} : memref<76x256xbf16, #tpu.memory_space<vmem>>, vector<8x256xbf16>,
    %41 = arith.truncf %18 : vector<8x256xf32> to vector<8x256xbf16>
    %c24 = arith.constant 24 : index
    %c0_18 = arith.constant 0 : index
    %42 = vector.load %arg7[%c24, %c0_18] : memref<76x256xbf16, #tpu.memory_space<vmem>>, vector<8x256xbf16>
    tpu.vector_store %arg7[%c24, %c0_18], %41 {strides = array<i32>} : memref<76x256xbf16, #tpu.memory_space<vmem>>, vector<8x256xbf16>,
    %43 = arith.truncf %8 : vector<8x256xf32> to vector<8x256xbf16>
    %c32 = arith.constant 32 : index
    %c0_19 = arith.constant 0 : index
    %44 = vector.load %arg7[%c32, %c0_19] : memref<76x256xbf16, #tpu.memory_space<vmem>>, vector<8x256xbf16>
    tpu.vector_store %arg7[%c32, %c0_19], %43 {strides = array<i32>} : memref<76x256xbf16, #tpu.memory_space<vmem>>, vector<8x256xbf16>,
    %45 = arith.truncf %25 : vector<8x256xf32> to vector<8x256xbf16>
    %c40 = arith.constant 40 : index
    %c0_20 = arith.constant 0 : index
    %46 = vector.load %arg7[%c40, %c0_20] : memref<76x256xbf16, #tpu.memory_space<vmem>>, vector<8x256xbf16>
    tpu.vector_store %arg7[%c40, %c0_20], %45 {strides = array<i32>} : memref<76x256xbf16, #tpu.memory_space<vmem>>, vector<8x256xbf16>,
    %cst_21 = arith.constant 0.000000e+00 : f32
    %47 = vector.broadcast %cst_21 : f32 to vector<8x16xf32>
    %48 = vector.extract_strided_slice %18 {offsets = [0, 16], sizes = [8, 240], strides = [1, 1]} : vector<8x256xf32> to vector<8x240xf32>
    %49 = tpu.concatenate %48, %47 in 1 : vector<8x240xf32>, vector<8x16xf32> -> vector<8x256xf32>
    %50 = arith.truncf %49 : vector<8x256xf32> to vector<8x256xbf16>
    %c48 = arith.constant 48 : index
    %c0_22 = arith.constant 0 : index
    %51 = vector.load %arg7[%c48, %c0_22] : memref<76x256xbf16, #tpu.memory_space<vmem>>, vector<8x256xbf16>
    tpu.vector_store %arg7[%c48, %c0_22], %50 {strides = array<i32>} : memref<76x256xbf16, #tpu.memory_space<vmem>>, vector<8x256xbf16>,
    %cst_23 = arith.constant 0.000000e+00 : f32
    %52 = vector.broadcast %cst_23 : f32 to vector<8x16xf32>
    %53 = vector.extract_strided_slice %8 {offsets = [0, 16], sizes = [8, 240], strides = [1, 1]} : vector<8x256xf32> to vector<8x240xf32>
    %54 = tpu.concatenate %53, %52 in 1 : vector<8x240xf32>, vector<8x16xf32> -> vector<8x256xf32>
    %55 = arith.truncf %54 : vector<8x256xf32> to vector<8x256xbf16>
    %c56 = arith.constant 56 : index
    %c0_24 = arith.constant 0 : index
    %56 = vector.load %arg7[%c56, %c0_24] : memref<76x256xbf16, #tpu.memory_space<vmem>>, vector<8x256xbf16>
    tpu.vector_store %arg7[%c56, %c0_24], %55 {strides = array<i32>} : memref<76x256xbf16, #tpu.memory_space<vmem>>, vector<8x256xbf16>,
    %cst_25 = arith.constant 0.000000e+00 : f32
    %57 = vector.broadcast %cst_25 : f32 to vector<8x16xf32>
    %58 = vector.extract_strided_slice %25 {offsets = [0, 16], sizes = [8, 240], strides = [1, 1]} : vector<8x256xf32> to vector<8x240xf32>
    %59 = tpu.concatenate %58, %57 in 1 : vector<8x240xf32>, vector<8x16xf32> -> vector<8x256xf32>
    %60 = arith.truncf %59 : vector<8x256xf32> to vector<8x256xbf16>
    %c64 = arith.constant 64 : index
    %c0_26 = arith.constant 0 : index
    %61 = vector.load %arg7[%c64, %c0_26] : memref<76x256xbf16, #tpu.memory_space<vmem>>, vector<8x256xbf16>
    tpu.vector_store %arg7[%c64, %c0_26], %60 {strides = array<i32>} : memref<76x256xbf16, #tpu.memory_space<vmem>>, vector<8x256xbf16>,
    %62 = vector.extract_strided_slice %1 {offsets = [16, 0], sizes = [4, 256], strides = [1, 1]} : vector<36x256xbf16> to vector<4x256xbf16>
    %c72 = arith.constant 72 : index
    %c0_27 = arith.constant 0 : index
    %63 = vector.load %arg7[%c72, %c0_27] : memref<76x256xbf16, #tpu.memory_space<vmem>>, vector<4x256xbf16>
    tpu.vector_store %arg7[%c72, %c0_27], %62 {strides = array<i32>} : memref<76x256xbf16, #tpu.memory_space<vmem>>, vector<4x256xbf16>,
    %c0_28 = arith.constant 0 : index
    %c0_29 = arith.constant 0 : index
    %64 = vector.load %arg4[%c0_28, %c0_29] : memref<8x76xbf16, #tpu.memory_space<vmem>>, vector<8x76xbf16>
    %c0_30 = arith.constant 0 : index
    %c0_31 = arith.constant 0 : index
    %65 = vector.load %arg7[%c0_30, %c0_31] : memref<76x256xbf16, #tpu.memory_space<vmem>>, vector<76x256xbf16>
    %cst_32 = arith.constant dense<0.000000e+00> : vector<8x256xf32>
    %66 = tpu.matmul %64, %65, %cst_32 {dimension_numbers = #tpu.dot_dimension_numbers<[1], [0], [0], [1], [0, 0, 1, 1], [], []>} : vector<8x76xbf16>, vector<76x256xbf16>, vector<8x256xf32> -> vector<8x256xf32>
    %c0_33 = arith.constant 0 : index
    %c0_34 = arith.constant 0 : index
    %67 = vector.load %arg5[%c0_33, %c0_34] : memref<8x1xf32, #tpu.memory_space<vmem>>, vector<8x1xf32>
    %68 = vector.broadcast %67 : vector<8x1xf32> to vector<8x256xf32>
    %69 = arith.addf %66, %68 : vector<8x256xf32>
    %cst_35 = arith.constant 0.000000e+00 : f32
    %70 = vector.broadcast %cst_35 : f32 to vector<8x256xf32>
    %71 = arith.maximumf %69, %70 : vector<8x256xf32>
    %c0_36 = arith.constant 0 : index
    %c0_37 = arith.constant 0 : index
    %c0_38 = arith.constant 0 : index
    %72 = vector.load %arg6[%c0_36, %c0_37, %c0_38] : memref<1x8x256xf32, #tpu.memory_space<vmem>>, vector<1x8x256xf32>
    %73 = vector.shape_cast %72 : vector<1x8x256xf32> to vector<8x256xf32>
    %74 = vector.shape_cast %71 : vector<8x256xf32> to vector<1x8x256xf32>
    tpu.vector_store %arg6[%c0_36, %c0_37, %c0_38], %74 {strides = array<i32>} : memref<1x8x256xf32, #tpu.memory_space<vmem>>, vector<1x8x256xf32>,
    return
  }
  func.func @transform_0(%arg0: i32) -> (i32, i32, i32) {
    %c0_i32 = arith.constant 0 : i32
    %c0_i32_0 = arith.constant 0 : i32
    %c0_i32_1 = arith.constant 0 : i32
    return %arg0, %c0_i32, %c0_i32_0 : i32, i32, i32
  }
  func.func @transform_1(%arg0: i32) -> (i32, i32) {
    %c0_i32 = arith.constant 0 : i32
    %c0_i32_0 = arith.constant 0 : i32
    %c0_i32_1 = arith.constant 0 : i32
    return %c0_i32, %c0_i32_0 : i32, i32
  }
  func.func @transform_2(%arg0: i32) -> (i32, i32) {
    %c0_i32 = arith.constant 0 : i32
    %c0_i32_0 = arith.constant 0 : i32
    %c0_i32_1 = arith.constant 0 : i32
    return %c0_i32, %c0_i32_0 : i32, i32
  }
  func.func @transform_3(%arg0: i32) -> (i32, i32) {
    %c0_i32 = arith.constant 0 : i32
    %c0_i32_0 = arith.constant 0 : i32
    %c0_i32_1 = arith.constant 0 : i32
    return %c0_i32, %c0_i32_0 : i32, i32
  }
  func.func @transform_4(%arg0: i32) -> (i32, i32) {
    %c0_i32 = arith.constant 0 : i32
    %c0_i32_0 = arith.constant 0 : i32
    %c0_i32_1 = arith.constant 0 : i32
    return %c0_i32, %c0_i32_0 : i32, i32
  }
  func.func @transform_5(%arg0: i32) -> (i32, i32, i32) {
    %c0_i32 = arith.constant 0 : i32
    %c0_i32_0 = arith.constant 0 : i32
    %c0_i32_1 = arith.constant 0 : i32
    return %arg0, %c0_i32, %c0_i32_0 : i32, i32, i32
  }
}

</mosaic_0001>

<bundles_post_ra>
// kernel: tpu_custom_call.1
= control target key start
LH: loop header
LB: loop body
LE: loop exit
PB: predicated region body
PF: predicated region fallthrough
CT: control target
= control target key end

     0   :  { %10 = vsyncpa [#allocation4], 0  ;;  %s1124_s0 = inlined_call_operand.vmem [shape: bf16[2,36,256], index: 0, kind: input, shape index: {}]   ;;  %s1125_s1 = inlined_call_operand.vmem [shape: bf16[8,36], index: 1, kind: input, shape index: {}]   ;;  %s1126_s2 = inlined_call_operand.vmem [shape: f32[8,1], index: 2, kind: input, shape index: {}]   ;;  %s1127_s3 = inlined_call_operand.vmem [shape: bf16[8,76], index: 3, kind: input, shape index: {}]   ;;  %s1128_s4 = inlined_call_operand.vmem [shape: f32[8,1], index: 4, kind: input, shape index: {}]   ;;  %s1129_s5 = inlined_call_operand.hbm [shape: f32[2,8,256], index: 5, kind: output, shape index: {}]  }
   0x1   :  { %12 = vsyncpa [#allocation4 + $0x1], 0  ;;  %s953_s18 = smov 0   ;;  %s955_s19 = smov 0  }
   0x2   :  { %s957_s20 = smov 0   ;;  %s959_s21 = smov 0  }
   0x3 LB: > { %s974_s22 = sadd.s32 4294967295, %s914_s21   ;;  %s679_s23 = sadd.s32 4294967294, %s914_s21   ;;  %s914_s21 = sphi %s959_s21, %s1143_s21   ;;  %s910_s20 = sphi %s957_s20, %s1142_s20   ;;  %s906_s19 = sphi %s955_s19, %s1141_s19   ;;  %s902_s18 = sphi %s953_s18, %s1140_s18  }
   0x4   : > { %s978_s24 = sadd.s32 1, %s914_s21   ;;  %s135_s25 = sadd.s32 1, %s910_s20 }
   0x5   : > { %s132_s26 = ssub.s32 %s914_s21, %s978_s24  ;;  %p145_p0 = scmp.ne.s32.totalorder %s910_s20, %s906_s19 }
   0x6   : > { %p133_p1 = scmp.eq.s32.totalorder %s132_s26, 0  ;;  %p146_p2 = scmp.eq.s32.totalorder %s974_s22, 1 }
   0x7   : > { %p151_p3 = scmp.ne.s32.totalorder %s906_s19, %s902_s18  ;;  %p152_p4 = scmp.eq.s32.totalorder %s679_s23, 1 }
   0x8   : > { %s989_s27 = scalar_select %p133_p1, %s910_s20, %s135_s25  }
   0x9   : > { %p991_p5 = por %p146_p2, %p145_p0  ;;  %p995_p6 = por %p152_p4, %p151_p3 }
   0xa   : > { %p682_p7 = scmp.ge.s32.totalorder %s914_s21, 1  ;;  %p190_p8 = scmp.lt.s32.totalorder %s914_s21, 3 }
   0xc   : > { %p191_p9 = pnand %p682_p7, %p190_p8 }
   0xd   : > { %p218_p10 = scmp.lt.s32.totalorder (!%p191_p9), %s974_s22, 1  ;;  %v916_v0 = vmov (!%p191_p9), 0   ;;  %v230_v1 = vld [vmem:[%s1126_s2] sm:$0xff] (!%p191_p9)  ;;  %vm265_vm0 = vcmask (!%p191_p9), 1041408   ;;  %vm261_vm1 = vcmask (!%p191_p9), 293888   ;;  %s917_s14 = smov (!%p191_p9), 127   ;;  %v315_v23 = vlaneseq (!%p191_p9) }
   0xe   : > { %194 = sbr.rel (%p191_p9) target bundleno = 750 (0x2ee), region = 40  ;;  %304 = vmatprep.mubr.bf16.mxu0 (!%p191_p9), %v916_v0  ;;  %774 = vset.pattern.permute.xlu0 (!%p191_p9), %v916_v0  ;;  %v229_v12 = vld [vmem:[%s1125_s1] sm:$0xf] (!%p191_p9)  ;;  %s918_s15 = smov (!%p191_p9), 1   ;;  %vm341_vm3 = vcmask (!%p191_p9), 1039360   ;;  %vm328_vm5 = vcmask (!%p191_p9), 7168  }
   0xf   : > { %233 = vperm.xlu0 (!%p191_p9), %774, %v230_v1   ;;  %592 = vmatprep.mubr.bf16.mxu1 (!%p191_p9), %v916_v0  ;;  %s919_s16 = smov (!%p191_p9), 16   ;;  %v316_v24 = vand.u32 (!%p191_p9), 127, %v315_v23  ;;  %vm354_vm8 = vcmask (!%p191_p9), 130048   ;;  %s920_s17 = smov (!%p191_p9), 112   ;;  %v495_v52 = vld [vmem:[%s1128_s4] sm:$0xff] (!%p191_p9)  ;;  %vm435_vm9 = vcmask (!%p191_p9), 916480  }
  0x10   : > { %815 = vset.pattern.permute.xlu1 (!%p191_p9), %v916_v0  ;;  %vm825_vm10 = vmneg (!%p191_p9), %vm354_vm8  ;;  %vm921_vm12 = vmmov (!%p191_p9), 1   ;;  %s215_s6 = sand.u32 (!%p191_p9), 1, %s906_s19  }
  0x11   : > { %v317_v25 = vadd.s32 (!%p191_p9), 128, %v316_v24  ;;  %v318_v27 = vand.u32 (!%p191_p9), 15, %v316_v24  ;;  %vm827_vm11 = vmpackc.low (!%p191_p9), %vm825_vm10, %vm825_vm10 }
  0x13   : > { %v319_v26 = vand.u32 (!%p191_p9), 15, %v317_v25  ;;  %vm1027_vm4 = vcmp.ge.s32.totalorder (!%p191_p9), %v318_v27, 1  ;;  %vm1035_vm7 = vcmp.le.s32.totalorder (!%p191_p9), %v318_v27, 14 }
  0x14   : > { %vm837_vm14 = vmpackc.low (!%p191_p9), %vm1027_vm4, %vm825_vm10 }
  0x15   : > { %s219_s7 = scalar_select %p218_p10, %s974_s22, 1  ;;  %vm1023_vm2 = vcmp.le.s32.totalorder %v319_v26, 14  ;;  %vm1031_vm6 = vcmp.ge.s32.totalorder %v319_v26, 1 }
  0x16   : > { %vm832_vm13 = vmpackc.low %vm1031_vm6, %vm921_vm12 }
  0x17   : > { %s729_s8 = smul.u32 40, %s219_s7  ;;  %vm840_vm15 = vmpackc.low %vm1023_vm2, %vm921_vm12  ;;  %s683_s7 = sshll.u32 %s215_s6, 4 }
  0x18   : > { %s217_s9 = scalar_lea.vmem [#allocation3], %s683_s7 }
  0x19   : > { %s222_s11 = scalar_lea.vmem %s1124_s0, %s729_s8  ;;  %s728_s8 = sshll.u32 %s974_s22, 8 }
  0x1a   : > { %v816_v2 = vld [vmem:[%s222_s11 + $0x4] ss:$8 sps:$4 sm:$0xff]   ;;  %v818_v3 = vld [vmem:[%s222_s11] ss:$8 sps:$4 sm:$0xff]   ;;  %v226_v4 = vld [vmem:[%s222_s11 + $0x10] sm:$0xff]  ;;  %s620_s10 = sshll.u32 %s217_s9, 4  ;;  %s1082_s13 = scalar_lea.hbm %s1129_s5, %s728_s8  ;;  %s1084_s10 = int_to_ptr.vmem [resolvable:$true] %s620_s10 }
  0x1b   : > { %v227_v5 = vld [vmem:[%s222_s11 + $0x18] sm:$0xff]  ;;  %272 = vmatprep.subr.bf16.mxu0 %v816_v2  ;;  %483 = vst [vmem:[#allocation2 + $0x48] sm:$0x33] %v226_v4  ;;  %v228_v7 = vld [vmem:[%s222_s11 + $0x20] sm:$0x33]  ;;  %s606_s22 = scalar_lea.sflag [#allocation4], %s215_s6 }
  0x1c   : > { %v688_v6 = vcombine.high %v226_v4, %v227_v5  ;;  %273 = vmatpush1.bf16.msra.mxu0 %v818_v3  ;;  %v687_v8 = vcombine.low %v226_v4, %v227_v5  ;;  %v690_v9 = vcombine.high %v228_v7, %v228_v7  ;;  %v689_v10 = vcombine.low %v228_v7, %v228_v7 }
  0x1e   : > { %274 = vmatprep.subr.bf16.mxu0 %v688_v6  ;;  %v267_v11 = vsel %vm265_vm0, %v689_v10, 0 }
  0x20   : > { %275 = vmatpush1.bf16.msra.mxu0 %v687_v8 }
  0x21   : > { %691 = vmatprep.subr.msk.bf16.mxu0 %vm265_vm0, %v690_v9  ;;  %vm845_vm0 = vmpackc.low %vm1035_vm7, %vm921_vm12 }
  0x24   : > { %277 = vmatpush1.bf16.msra.mxu0 %v267_v11 }
  0x27   : > { %692 = vmatmul.mubr.msk.bf16.vlgmr.msra.gmra.mrb[0].mxu0 %vm261_vm1, %v229_v12  ;;  %vm848_vm1 = vmpackc.low %vm435_vm9, %vm435_vm9 }
  0x8e   : > { %v234_v13 = vpop.permute.xlu0 %233 }
  0xfa   : > { %v306_v14 = vpop.f32.mrb[0].mxu0 }
  0xfb   : > { %v1012_v15 = vadd.f32 %v306_v14, %v234_v13  ;;  %v308_v16 = vpop.f32.mrb[1].mxu0 }
  0xfc   : > { %v1014_v17 = vadd.f32 %v308_v16, %v234_v13  ;;  %v310_v18 = vpop.f32.mrb[2].mxu0 }
  0xfd   : > { %v313_v19 = vmax.f32 %v1012_v15, 0.0  ;;  %v311_v20 = vpop.f32.mrb[3].mxu0  ;;  %v484_v15 = vld [vmem:[%s1127_s3] sm:$0xf] }
  0xfe   : > { %v314_v21 = vmax.f32 %v1014_v17, 0.0  ;;  %v494_v20 = vld [vmem:[#allocation2 + $0x48] sm:$0x33] }
 0x100   : > { %v780_v22 = vpack.i.bf16 %v314_v21, %v313_v19 }
 0x102   : > { %781 = vrot.lane.b32.xlu1 %v780_v22, %s917_s14  ;;  %776 = vrot.lane.b32.xlu0 %v780_v22, %s918_s15  ;;  %s852_s14 = scalar_lea.vmem %s1084_s10, 256  ;;  %s922_s15 = smov [#allocation3]  }
 0x103   : > { %p853_p11 = scmp.ne.s32.totalorder %s1084_s10, %s852_s14 }
 0x105   : > { %p854_p12 = pnand %p853_p11, %p991_p5 }
 0x106   : > { %786 = vrot.lane.b32.xlu0 %v780_v22, %s919_s16 }
 0x107   : > { %p855_p13 = pneg %p854_p12 }
 0x174   : > { %v782_v29 = vpop.permute.xlu1 %781  ;;  %v777_v31 = vpop.permute.xlu0 %776 }
 0x175   : > { %v784_v34 = vunpack.i.h.bf16 %v782_v29  ;;  %v783_v35 = vunpack.i.l.bf16 %v782_v29  ;;  %v779_v36 = vunpack.i.h.bf16 %v777_v31  ;;  %v778_v37 = vunpack.i.l.bf16 %v777_v31 }
 0x177   : > { %v345_v38 = vsel %vm341_vm3, %v784_v34, 0.0  ;;  %v342_v39 = vsel %vm341_vm3, %v783_v35, %v784_v34  ;;  %v329_v40 = vsel %vm328_vm5, %v778_v37, %v779_v36  ;;  %v332_v41 = vsel %vm328_vm5, 0.0, %v778_v37 }
 0x178   : > { %v347_v42 = vsel %vm1023_vm2, %v345_v38, 0.0  ;;  %v333_v43 = vsel %vm1027_vm4, %v332_v41, 0.0  ;;  %v787_v44 = vpop.permute.xlu0 %786  ;;  %v334_v45 = vsel %vm1031_vm6, %v329_v40, 0.0  ;;  %v346_v46 = vsel %vm1035_vm7, %v342_v39, 0.0 }
 0x179   : > { %v789_v47 = vunpack.i.h.bf16 %v787_v44  ;;  %v788_v48 = vunpack.i.l.bf16 %v787_v44  ;;  %v805_v49 = vpack.i.bf16 %v334_v45, %v333_v43  ;;  %v810_v51 = vpack.i.bf16 %v347_v42, %v346_v46 }
 0x17a   : > { %v841_v16 = vpack.c.bf16 %v345_v38, %v314_v21  ;;  %v846_v18 = vpack.c.bf16 %v342_v39, %v313_v19  ;;  %vm553_vm2 = vcmask 1045504   ;;  %vm549_vm3 = vcmask 621568  }
 0x17b   : > { %v372_v50 = vsel %vm354_vm8, %v788_v48, %v789_v47  ;;  %806 = vrot.lane.b32.xlu0 %v805_v49, %s920_s17  ;;  %791 = vrot.lane.b32.xlu1 %v805_v49, %s919_s16 }
 0x17f   : > { %811 = vrot.lane.b32.xlu0 %v810_v51, %s920_s17  ;;  %796 = vrot.lane.b32.xlu1 %v810_v51, %s919_s16  ;;  %s856_s16 = sshll.u32 %s922_s15, 4  ;;  %s857_s16 = int_to_ptr.vmem [resolvable:$false] %s856_s16 }
 0x180   : > { %p859_p0 = scmp.lt.s32.totalorder %s1084_s10, %s857_s16 }
 0x183   : > { %801 = vrot.lane.b32.xlu1 %v780_v22, %s920_s17  ;;  %s858_s17 = scalar_lea.vmem %s857_s16, 512 }
 0x184   : > { %p860_p1 = scmp.lt.s32.totalorder %s858_s17, %s852_s14 }
 0x186   : > { %p861_p2 = por %p860_p1, %p859_p0 }
 0x187   : > { %498 = vperm.xlu1 %815, %v495_v52  }
 0x188   : > { %p862_p3 = pnand %p861_p2, %p855_p13 }
 0x1ed   : > { %v807_v53 = vpop.permute.xlu0 %806  ;;  %v792_v56 = vpop.permute.xlu1 %791 }
 0x1ee   : > { %v809_v54 = vunpack.i.h.bf16 %v807_v53  ;;  %v808_v55 = vunpack.i.l.bf16 %v807_v53  ;;  %v794_v57 = vunpack.i.h.bf16 %v792_v56  ;;  %v793_v58 = vunpack.i.l.bf16 %v792_v56 }
 0x1f0   : > { %v436_v59 = vsel %vm435_vm9, %v808_v55, %v809_v54  ;;  %v355_v60 = vsel %vm354_vm8, %v793_v58, %v794_v57  ;;  %v828_v11 = vpack.c.bf16 %v788_v48, %v793_v58 }
 0x1f1   : > { %v812_v61 = vpop.permute.xlu0 %811  ;;  %v797_v0 = vpop.permute.xlu1 %796  ;;  %v823_v5 = vpack.c.bf16 %v372_v50, %v355_v60 }
 0x1f2   : > { %v814_v62 = vunpack.i.h.bf16 %v812_v61  ;;  %v813_v63 = vunpack.i.l.bf16 %v812_v61  ;;  %v799_v1 = vunpack.i.h.bf16 %v797_v0  ;;  %v798_v2 = vunpack.i.l.bf16 %v797_v0 }
 0x1f3   : > { %560 = vmatprep.subr.bf16.mxu1 %v823_v5 }
 0x1f4   : > { %v473_v3 = vsel %vm435_vm9, %v814_v62, 0.0  ;;  %v470_v4 = vsel %vm435_vm9, %v813_v63, %v814_v62  ;;  %v391_v7 = vsel %vm354_vm8, %v798_v2, %v799_v1  ;;  %829 = vmatpush1.bf16.msk.msra.mxu1 %vm827_vm11, %v828_v11  ;;  %v838_v14 = vpack.c.bf16 %v332_v41, %v798_v2 }
 0x1f5   : > { %v727_v6 = vpack.c.bf16 %v473_v3, %v470_v4  ;;  %v802_v8 = vpop.permute.xlu1 %801  ;;  %v833_v13 = vpack.c.bf16 %v329_v40, %v391_v7 }
 0x1f6   : > { %v804_v9 = vunpack.i.h.bf16 %v802_v8  ;;  %v803_v10 = vunpack.i.l.bf16 %v802_v8 }
 0x1f7   : > { %834 = vmatprep.subr.msk.bf16.mxu1 %vm832_vm13, %v833_v13  ;;  %v711_v24 = vcombine.high %v727_v6, %v494_v20  ;;  %v710_v17 = vcombine.low %v727_v6, %v494_v20 }
 0x1f8   : > { %v453_v12 = vsel %vm435_vm9, %v803_v10, %v804_v9  ;;  %839 = vmatpush1.bf16.msk.msra.mxu1 %vm837_vm14, %v838_v14  ;;  %v849_v22 = vpack.c.bf16 %v804_v9, %v809_v54 }
 0x1f9   : > { %842 = vmatprep.subr.msk.bf16.mxu1 %vm840_vm15, %v841_v16  ;;  %v851_v23 = vpack.c.bf16 %v453_v12, %v436_v59  ;;  %v555_v21 = vsel %vm553_vm2, %v710_v17, 0 }
 0x1fc   : > { %847 = vmatpush1.bf16.msk.msra.mxu1 %vm845_vm0, %v846_v18 }
 0x1fd   : > { %850 = vmatprep.subr.msk.bf16.mxu1 %vm848_vm1, %v849_v22 }
 0x200   : > { %567 = vmatpush1.bf16.msra.mxu1 %v851_v23 }
 0x201   : > { %712 = vmatprep.subr.msk.bf16.mxu1 %vm553_vm2, %v711_v24 }
 0x204   : > { %569 = vmatpush1.bf16.msra.mxu1 %v555_v21 }
 0x206   : > { %v499_v19 = vpop.permute.xlu1 %498 }
 0x207   : > { %713 = vmatmul.mubr.msk.bf16.vlgmr.msra.gmra.mrb[0].mxu1 %vm549_vm3, %v484_v15 }
 0x2da   : > { %v594_v25 = vpop.f32.mrb[0].mxu1 }
 0x2db   : > { %v595_v26 = vadd.f32 %v594_v25, %v499_v19  ;;  %v596_v27 = vpop.f32.mrb[1].mxu1 }
 0x2dc   : > { %v597_v28 = vadd.f32 %v596_v27, %v499_v19  ;;  %v598_v29 = vpop.f32.mrb[2].mxu1 }
 0x2dd   : > { %v601_v30 = vmax.f32 %v595_v26, 0.0  ;;  %v599_v31 = vpop.f32.mrb[3].mxu1 }
 0x2de   : > { %v602_v32 = vmax.f32 %v597_v28, 0.0 }
 0x2df   : > { %603 = vst [vmem:[%s217_s9] sm:$0xff] %v601_v30 }
 0x2e0   : > { %604 = vst [vmem:[%s217_s9 + $0x8] sm:$0xff] %v602_v32 }
 0x2e1   : > { %865 = shalt.err (!%p862_p3)
}
 0x2e2   : > { %s866_s23 = scalar_lea.hbm %s1082_s13, 256  ;;  %s870_s30 = scalar_lea.hbm %s1129_s5, 512 }
 0x2e3   : > { %p867_p4 = scmp.ne.s32.totalorder %s1082_s13, %s866_s23  ;;  %p871_p9 = scmp.lt.u32.totalorder %s1082_s13, %s1129_s5 }
 0x2e4   : > { %p872_p10 = scmp.lt.u32.totalorder %s870_s30, %s866_s23  ;;  %p874_p12 = scmp.lt.u32.totalorder %s866_s23, %s1082_s13 }
 0x2e5   : > { %p868_p7 = pnand %p867_p4, %p991_p5 }
 0x2e6   : > { %p873_p11 = por %p872_p10, %p871_p9 }
 0x2e7   : > { %p869_p8 = pneg %p868_p7 }
 0x2e8   : > { %p875_p13 = por %p874_p12, %p873_p11 }
 0x2ea   : > { %p876_p0 = pnand %p875_p13, %p869_p8 }
 0x2ec   : > { %879 = shalt.err (!%p876_p0)
}
 0x2ed   : > { %730 = dma.vmem_to_hbm [thread:$0]  (%p991_p5), %s1084_s10, 256, %s1082_s13, %s606_s22  }
 0x2ee PF: > { %p736_p1 = scmp.ge.s32.totalorder %s914_s21, 2  ;;  %s632_s8 = sand.u32 1, %s902_s18  }
 0x2ef   : > { %s633_s9 = scalar_lea.sflag [#allocation4], %s632_s8 }
 0x2f0   : > { %p733_p2 = pnand %p736_p1, %p995_p6 }
 0x2f2   : > { %897 = dma.done.wait (!%p733_p2), %s633_s9, 256  }
 0x2f3   : > { %899 = vsyncadd (!%p733_p2), %s633_s9, 4294967040  ;;  %p15_p3 = scmp.ge.s32.totalorder %s978_s24, 4   ;;  %s1140_s18 = smov %s906_s19 }
 0x2f4   : > { %s1141_s19 = smov %s910_s20  ;;  %s1142_s20 = smov %s989_s27 }
 0x2f5   : > { %s1143_s21 = smov %s978_s24  ;;  %17 = sbr.rel (!%p15_p3) target bundleno = 3 (0x3), region = 75 }
 0x2fc   :  { %638 = vsyncpa [#allocation4], 1 }
 0x2fd   :  { %640 = vsyncpa [#allocation4 + $0x1], 1 }

</bundles_post_ra>
